<compile_context>
chip_gen: v7x
topology: tpu7x:2x2x1
jax: 0.10.0
libtpu: 0.0.40
codegen_flags: <defaults>
</compile_context>

<pallas_src>
import functools

import jax
import jax.numpy as jnp
from jax.experimental import pallas as pl
from jax.experimental.pallas import tpu as pltpu


# Lane-axis tile for the gating stage: bounds gate intermediates to (C, tile)
# while keeping stores unmasked (multiples of 128 lanes whenever TS allows).
_MAX_GATE_TILE = 512
# Fold the whole batch into one grid step when the x slab is this small
# (per-step overhead ~0.35us dominates tiny problems on single-TC chips).
_FOLD_BATCH_BYTES = 2 << 20


def _pick_gate_tile(ts, max_tile=_MAX_GATE_TILE):
    """Largest 128-aligned divisor of TS that is <= max_tile (or TS itself)."""
    if ts <= max_tile:
        return ts
    for cand in range(max_tile, 127, -128):
        if ts % cand == 0:
            return cand
    return ts  # no aligned divisor: fall back to one full-width chunk


def tama_kernel(x_ref, pool_ref, expt_ref, exps_ref,
                w1_ref, b1_ref, w2_ref, b2_ref, o_ref, *, tile):
    """One (bb, C, TS) block per grid step; everything stays lane-dense."""
    bb, _, TS = x_ref.shape
    T = expt_ref.shape[0]
    n_chunks = TS // tile

    # bf16-stored constants -> f32 compute (values are exact in bf16; DEFAULT
    # matmul precision rounds operands to bf16 on the MXU anyway).
    pool = pool_ref[...].astype(jnp.float32)          # (TS, T+S)
    w1 = w1_ref[...]                                  # (Cmid, C)  BN folded
    b1 = b1_ref[...]                                  # (Cmid, 1)  BN folded
    w2 = w2_ref[...]                                  # (C, Cmid)
    b2 = b2_ref[...]                                  # (C, 1)

    for i in range(bb):                               # static unroll over batch block
        x = x_ref[i].astype(jnp.float32)              # (C, TS)

        # Pooled descriptors for BOTH branches with one MXU matmul:
        #   z[:, :T] = mean over S (temporal), z[:, T:] = mean over T (modal).
        z = jnp.dot(x, pool, preferred_element_type=jnp.float32)        # (C, T+S)

        # 1x1 conv (BN folded) + ReLU + 1x1 conv + sigmoid on the fused slab.
        y = jnp.maximum(jnp.dot(w1, z, preferred_element_type=jnp.float32) + b1, 0.0)
        g = jnp.dot(w2, y, preferred_element_type=jnp.float32) + b2
        f = jax.nn.sigmoid(g)                         # (C, T+S)
        f_t = f[:, :T]                                # (C, T) temporal gates
        f_s = f[:, T:]                                # (C, S) modal gates

        # Gate broadcast + multiply, chunked over the lane axis so we never
        # materialize a full (C, TS) gate slab.  Expansion matrices are 0/1
        # selectors: gate_t[c, t*S+s] = f_t[c, t], gate_s[c, t*S+s] = f_s[c, s].
        for j in range(n_chunks):                     # static offsets
            lo, hi = j * tile, (j + 1) * tile
            xc = x_ref[i, :, lo:hi].astype(jnp.float32)                  # (C, tile)
            et = expt_ref[:, lo:hi].astype(jnp.float32)                  # (T, tile)
            es = exps_ref[:, lo:hi].astype(jnp.float32)                  # (S, tile)
            gt = jnp.dot(f_t, et, preferred_element_type=jnp.float32)    # (C, tile)
            gs = jnp.dot(f_s, es, preferred_element_type=jnp.float32)    # (C, tile)
            o_ref[i, :, lo:hi] = (xc * gt * gs).astype(o_ref.dtype)


def tama_forward(x, params, eps=1e-5, batch_block=None):
    """x: (B, C, T, S).  params: dict of TAMA parameters (see init_params)."""
    B, C, T, S = x.shape
    TS = T * S
    w1, b1 = params["w1"], params["b1"]                       # (Cmid, C), (Cmid,)
    gamma, beta = params["bn_gamma"], params["bn_beta"]
    rmean, rvar = params["bn_mean"], params["bn_var"]
    w2, b2 = params["w2"], params["b2"]                       # (C, Cmid), (C,)
    Cmid = w1.shape[0]

    # Fold eval-mode BatchNorm into the first conv (parameter glue, plain JAX).
    bn_scale = gamma / jnp.sqrt(rvar + eps)
    bn_bias = beta - rmean * bn_scale
    w1f = (w1 * bn_scale[:, None]).astype(jnp.float32)        # (Cmid, C)
    b1f = (bn_scale * b1 + bn_bias).reshape(Cmid, 1).astype(jnp.float32)
    w2f = w2.astype(jnp.float32)
    b2c = b2.reshape(C, 1).astype(jnp.float32)

    # Constant pooling / expansion matrices.  r = t*S + s (row-major reshape).
    # All entries are 0, 1, 1/S or 1/T -> stored bf16 (exact for pow-2 sizes,
    # and well within tolerance otherwise); halves their VMEM/DMA footprint.
    r = jnp.arange(TS)
    t_idx, s_idx = r // S, r % S
    onehot_t = (t_idx[:, None] == jnp.arange(T)[None, :]).astype(jnp.float32)  # (TS, T)
    onehot_s = (s_idx[:, None] == jnp.arange(S)[None, :]).astype(jnp.float32)  # (TS, S)
    pool = jnp.concatenate([onehot_t / S, onehot_s / T], axis=1).astype(jnp.bfloat16)
    expt = onehot_t.T.astype(jnp.bfloat16)                    # (T, TS) 0/1 selector
    exps = onehot_s.T.astype(jnp.bfloat16)                    # (S, TS) 0/1 selector

    x_flat = x.reshape(B, C, TS)                              # free contiguous reshape

    itemsize = jnp.dtype(x.dtype).itemsize
    if batch_block is None:
        # Fold tiny problems into one grid step (kills per-step overhead on
        # v5e/v6e); keep per-batch steps for big slabs so v7x's 2 TCs share work.
        batch_block = B if B * C * TS * itemsize <= _FOLD_BATCH_BYTES else 1
    bb = batch_block
    assert B % bb == 0, "batch_block must divide the batch size"

    tile = _pick_gate_tile(TS)

    # Explicit VMEM budget: double-buffered in/out blocks + constants + margin,
    # clamped to stay inside v7x's 64 MiB physical VMEM.
    block_bytes = bb * C * TS * itemsize
    const_bytes = ((pool.size + expt.size + exps.size) * 2
                   + (w1f.size + b1f.size + w2f.size + b2c.size) * 4)
    need = 4 * block_bytes + 2 * const_bytes + (4 << 20)
    vmem_limit = int(min(max(need, 16 << 20), 64 << 20))

    kernel = functools.partial(tama_kernel, tile=tile)

    out_flat = pl.pallas_call(
        kernel,
        out_shape=jax.ShapeDtypeStruct((B, C, TS), x.dtype),
        grid_spec=pl.GridSpec(
            grid=(B // bb,),
            in_specs=[
                pl.BlockSpec((bb, C, TS), lambda i: (i, 0, 0)),     # x (lane-dense)
                pl.BlockSpec((TS, T + S), lambda i: (0, 0)),        # pooling matrix (bf16)
                pl.BlockSpec((T, TS), lambda i: (0, 0)),            # temporal expansion (bf16)
                pl.BlockSpec((S, TS), lambda i: (0, 0)),            # modal expansion (bf16)
                pl.BlockSpec((Cmid, C), lambda i: (0, 0)),          # w1 (BN folded)
                pl.BlockSpec((Cmid, 1), lambda i: (0, 0)),          # b1 (BN folded)
                pl.BlockSpec((C, Cmid), lambda i: (0, 0)),          # w2
                pl.BlockSpec((C, 1), lambda i: (0, 0)),             # b2
            ],
            out_specs=pl.BlockSpec((bb, C, TS), lambda i: (i, 0, 0)),
        ),
        compiler_params=pltpu.CompilerParams(
            dimension_semantics=("parallel",),
            vmem_limit_bytes=vmem_limit),
    )(x_flat, pool, expt, exps, w1f, b1f, w2f, b2c)

    return out_flat.reshape(B, C, T, S)


def tama_reference(x, params, eps=1e-5):
    """Pure-JAX reference mirroring the PyTorch forward (eval-mode BN)."""
    w1, b1 = params["w1"], params["b1"]
    gamma, beta = params["bn_gamma"], params["bn_beta"]
    rmean, rvar = params["bn_mean"], params["bn_var"]
    w2, b2 = params["w2"], params["b2"]
    b, c, t, s = x.shape
    ta = jnp.mean(x, axis=-1, keepdims=True)                  # (b,c,t,1)
    ma = jnp.mean(x, axis=2, keepdims=True)                   # (b,c,1,s)
    ta = jnp.transpose(ta, (0, 1, 3, 2))                      # (b,c,1,t)
    cat = jnp.concatenate([ma, ta], axis=3)                   # (b,c,1,s+t)
    y = jnp.einsum("oc,bchw->bohw", w1, cat) + b1[None, :, None, None]
    y = (y - rmean[None, :, None, None]) / jnp.sqrt(rvar[None, :, None, None] + eps)
    y = y * gamma[None, :, None, None] + beta[None, :, None, None]
    y = jnp.maximum(y, 0.0)
    split_ta = jnp.transpose(y[:, :, :, s:], (0, 1, 3, 2))    # (b,cmid,t,1)
    split_ma = y[:, :, :, :s]                                 # (b,cmid,1,s)
    f_t = jax.nn.sigmoid(jnp.einsum("oc,bchw->bohw", w2, split_ta) + b2[None, :, None, None])
    f_s = jax.nn.sigmoid(jnp.einsum("oc,bchw->bohw", w2, split_ma) + b2[None, :, None, None])
    return x * f_t * f_s


def init_params(key, in_channel, ratio):
    """Deterministic synthetic parameters matching the module's shapes."""
    c_mid = in_channel // ratio
    ks = jax.random.split(key, 8)
    return {
        # conv_1: Conv2d(in_channel, c_mid, 1) -> weight (c_mid, in_channel, 1, 1)
        "w1": jax.random.normal(ks[0], (c_mid, in_channel), jnp.float32) * 0.2,
        "b1": jax.random.normal(ks[1], (c_mid,), jnp.float32) * 0.1,
        # BatchNorm2d(c_mid) -- eval-mode running stats + affine params
        "bn_gamma": 1.0 + 0.1 * jax.random.normal(ks[2], (c_mid,), jnp.float32),
        "bn_beta": 0.1 * jax.random.normal(ks[3], (c_mid,), jnp.float32),
        "bn_mean": 0.1 * jax.random.normal(ks[4], (c_mid,), jnp.float32),
        "bn_var": 1.0 + 0.1 * jax.random.uniform(ks[5], (c_mid,), jnp.float32),
        # block: Conv2d(c_mid, in_channel, 1) -> weight (in_channel, c_mid, 1, 1)
        "w2": jax.random.normal(ks[6], (in_channel, c_mid), jnp.float32) * 0.2,
        "b2": jax.random.normal(ks[7], (in_channel,), jnp.float32) * 0.1,
    }


if __name__ == "__main__":
    # TODO(synk): BatchNorm2d is implemented in eval mode (running stats folded
    # into the 1x1-conv weights); training-mode batch statistics are not
    # computed in-kernel.
    B, C, T, S = 2, 32, 16, 16
    RATIO = 4

    key = jax.random.PRNGKey(0)
    kx, kp = jax.random.split(key)
    x = jax.random.normal(kx, (B, C, T, S), jnp.float32)
    params = init_params(kp, C, RATIO)

    out = tama_forward(x, params)
    out = jax.block_until_ready(out)

    ref = tama_reference(x, params)
    assert out.shape == (B, C, T, S)
    assert jnp.allclose(out, ref, rtol=1e-2, atol=1e-2), "mismatch vs reference"

    print("KERNEL_OK")
</pallas_src>

<mosaic_0001>
module attributes {stable_mosaic.version = 11 : i64} {
  func.func @tama_kernel(%arg0: i32, %arg1: memref<2x32x256xf32, #tpu.memory_space<vmem>>, %arg2: memref<256x32xbf16, #tpu.memory_space<vmem>>, %arg3: memref<16x256xbf16, #tpu.memory_space<vmem>>, %arg4: memref<16x256xbf16, #tpu.memory_space<vmem>>, %arg5: memref<8x32xf32, #tpu.memory_space<vmem>>, %arg6: memref<8x1xf32, #tpu.memory_space<vmem>>, %arg7: memref<32x8xf32, #tpu.memory_space<vmem>>, %arg8: memref<32x1xf32, #tpu.memory_space<vmem>>, %arg9: memref<2x32x256xf32, #tpu.memory_space<vmem>>) attributes {dimension_semantics = [#tpu.dimension_semantics<parallel>], iteration_bounds = array<i64: 1>, scalar_prefetch = 0 : i64, scratch_operands = 0 : i64, tpu.core_type = #tpu.core_type<tc>, window_params = [{transform_indices = @transform_0, window_bounds = array<i64: 2, 32, 256>}, {pipeline_mode = #tpu.pipeline_mode<synchronous>, transform_indices = @transform_1, window_bounds = array<i64: 256, 32>}, {pipeline_mode = #tpu.pipeline_mode<synchronous>, transform_indices = @transform_2, window_bounds = array<i64: 16, 256>}, {pipeline_mode = #tpu.pipeline_mode<synchronous>, transform_indices = @transform_3, window_bounds = array<i64: 16, 256>}, {pipeline_mode = #tpu.pipeline_mode<synchronous>, transform_indices = @transform_4, window_bounds = array<i64: 8, 32>}, {pipeline_mode = #tpu.pipeline_mode<synchronous>, transform_indices = @transform_5, window_bounds = array<i64: 8, 1>}, {pipeline_mode = #tpu.pipeline_mode<synchronous>, transform_indices = @transform_6, window_bounds = array<i64: 32, 8>}, {pipeline_mode = #tpu.pipeline_mode<synchronous>, transform_indices = @transform_7, window_bounds = array<i64: 32, 1>}, {transform_indices = @transform_8, window_bounds = array<i64: 2, 32, 256>}]} {
    %c0 = arith.constant 0 : index
    %c0_0 = arith.constant 0 : index
    %0 = vector.load %arg2[%c0, %c0_0] : memref<256x32xbf16, #tpu.memory_space<vmem>>, vector<256x32xbf16>
    %1 = arith.extf %0 : vector<256x32xbf16> to vector<256x32xf32>
    %c0_1 = arith.constant 0 : index
    %c0_2 = arith.constant 0 : index
    %2 = vector.load %arg5[%c0_1, %c0_2] : memref<8x32xf32, #tpu.memory_space<vmem>>, vector<8x32xf32>
    %c0_3 = arith.constant 0 : index
    %c0_4 = arith.constant 0 : index
    %3 = vector.load %arg6[%c0_3, %c0_4] : memref<8x1xf32, #tpu.memory_space<vmem>>, vector<8x1xf32>
    %c0_5 = arith.constant 0 : index
    %c0_6 = arith.constant 0 : index
    %4 = vector.load %arg7[%c0_5, %c0_6] : memref<32x8xf32, #tpu.memory_space<vmem>>, vector<32x8xf32>
    %c0_7 = arith.constant 0 : index
    %c0_8 = arith.constant 0 : index
    %5 = vector.load %arg8[%c0_7, %c0_8] : memref<32x1xf32, #tpu.memory_space<vmem>>, vector<32x1xf32>
    %c0_9 = arith.constant 0 : index
    %c0_10 = arith.constant 0 : index
    %c0_11 = arith.constant 0 : index
    %6 = vector.load %arg1[%c0_9, %c0_10, %c0_11] : memref<2x32x256xf32, #tpu.memory_space<vmem>>, vector<1x32x256xf32>
    %7 = vector.shape_cast %6 : vector<1x32x256xf32> to vector<32x256xf32>
    %cst = arith.constant dense<0.000000e+00> : vector<32x32xf32>
    %8 = tpu.matmul %7, %1, %cst {dimension_numbers = #tpu.dot_dimension_numbers<[1], [0], [0], [1], [0, 0, 1, 1], [], []>} : vector<32x256xf32>, vector<256x32xf32>, vector<32x32xf32> -> vector<32x32xf32>
    %cst_12 = arith.constant dense<0.000000e+00> : vector<8x32xf32>
    %9 = tpu.matmul %2, %8, %cst_12 {dimension_numbers = #tpu.dot_dimension_numbers<[1], [0], [0], [1], [0, 0, 1, 1], [], []>} : vector<8x32xf32>, vector<32x32xf32>, vector<8x32xf32> -> vector<8x32xf32>
    %10 = vector.broadcast %3 : vector<8x1xf32> to vector<8x32xf32>
    %11 = arith.addf %9, %10 : vector<8x32xf32>
    %cst_13 = arith.constant 0.000000e+00 : f32
    %12 = vector.broadcast %cst_13 : f32 to vector<8x32xf32>
    %13 = arith.maximumf %11, %12 : vector<8x32xf32>
    %cst_14 = arith.constant dense<0.000000e+00> : vector<32x32xf32>
    %14 = tpu.matmul %4, %13, %cst_14 {dimension_numbers = #tpu.dot_dimension_numbers<[1], [0], [0], [1], [0, 0, 1, 1], [], []>} : vector<32x8xf32>, vector<8x32xf32>, vector<32x32xf32> -> vector<32x32xf32>
    %15 = vector.broadcast %5 : vector<32x1xf32> to vector<32x32xf32>
    %16 = arith.addf %14, %15 : vector<32x32xf32>
    %17 = arith.negf %16 : vector<32x32xf32>
    %18 = math.exp %17 : vector<32x32xf32>
    %cst_15 = arith.constant 1.000000e+00 : f32
    %19 = vector.broadcast %cst_15 : f32 to vector<32x32xf32>
    %20 = arith.addf %19, %18 : vector<32x32xf32>
    %21 = arith.divf %19, %20 : vector<32x32xf32>
    %22 = vector.extract_strided_slice %21 {offsets = [0, 0], sizes = [32, 16], strides = [1, 1]} : vector<32x32xf32> to vector<32x16xf32>
    %23 = vector.extract_strided_slice %21 {offsets = [0, 16], sizes = [32, 16], strides = [1, 1]} : vector<32x32xf32> to vector<32x16xf32>
    %c0_16 = arith.constant 0 : index
    %c0_17 = arith.constant 0 : index
    %c0_18 = arith.constant 0 : index
    %24 = vector.load %arg1[%c0_16, %c0_17, %c0_18] : memref<2x32x256xf32, #tpu.memory_space<vmem>>, vector<1x32x256xf32>
    %25 = vector.shape_cast %24 : vector<1x32x256xf32> to vector<32x256xf32>
    %c0_19 = arith.constant 0 : index
    %c0_20 = arith.constant 0 : index
    %26 = vector.load %arg3[%c0_19, %c0_20] : memref<16x256xbf16, #tpu.memory_space<vmem>>, vector<16x256xbf16>
    %27 = arith.extf %26 : vector<16x256xbf16> to vector<16x256xf32>
    %c0_21 = arith.constant 0 : index
    %c0_22 = arith.constant 0 : index
    %28 = vector.load %arg4[%c0_21, %c0_22] : memref<16x256xbf16, #tpu.memory_space<vmem>>, vector<16x256xbf16>
    %29 = arith.extf %28 : vector<16x256xbf16> to vector<16x256xf32>
    %cst_23 = arith.constant dense<0.000000e+00> : vector<32x256xf32>
    %30 = tpu.matmul %22, %27, %cst_23 {dimension_numbers = #tpu.dot_dimension_numbers<[1], [0], [0], [1], [0, 0, 1, 1], [], []>} : vector<32x16xf32>, vector<16x256xf32>, vector<32x256xf32> -> vector<32x256xf32>
    %cst_24 = arith.constant dense<0.000000e+00> : vector<32x256xf32>
    %31 = tpu.matmul %23, %29, %cst_24 {dimension_numbers = #tpu.dot_dimension_numbers<[1], [0], [0], [1], [0, 0, 1, 1], [], []>} : vector<32x16xf32>, vector<16x256xf32>, vector<32x256xf32> -> vector<32x256xf32>
    %32 = arith.mulf %25, %30 : vector<32x256xf32>
    %33 = arith.mulf %32, %31 : vector<32x256xf32>
    %c0_25 = arith.constant 0 : index
    %c0_26 = arith.constant 0 : index
    %c0_27 = arith.constant 0 : index
    %34 = vector.load %arg9[%c0_25, %c0_26, %c0_27] : memref<2x32x256xf32, #tpu.memory_space<vmem>>, vector<1x32x256xf32>
    %35 = vector.shape_cast %34 : vector<1x32x256xf32> to vector<32x256xf32>
    %36 = vector.shape_cast %33 : vector<32x256xf32> to vector<1x32x256xf32>
    tpu.vector_store %arg9[%c0_25, %c0_26, %c0_27], %36 {strides = array<i32>} : memref<2x32x256xf32, #tpu.memory_space<vmem>>, vector<1x32x256xf32>,
    %c1 = arith.constant 1 : index
    %c0_28 = arith.constant 0 : index
    %c0_29 = arith.constant 0 : index
    %37 = vector.load %arg1[%c1, %c0_28, %c0_29] : memref<2x32x256xf32, #tpu.memory_space<vmem>>, vector<1x32x256xf32>
    %38 = vector.shape_cast %37 : vector<1x32x256xf32> to vector<32x256xf32>
    %cst_30 = arith.constant dense<0.000000e+00> : vector<32x32xf32>
    %39 = tpu.matmul %38, %1, %cst_30 {dimension_numbers = #tpu.dot_dimension_numbers<[1], [0], [0], [1], [0, 0, 1, 1], [], []>} : vector<32x256xf32>, vector<256x32xf32>, vector<32x32xf32> -> vector<32x32xf32>
    %cst_31 = arith.constant dense<0.000000e+00> : vector<8x32xf32>
    %40 = tpu.matmul %2, %39, %cst_31 {dimension_numbers = #tpu.dot_dimension_numbers<[1], [0], [0], [1], [0, 0, 1, 1], [], []>} : vector<8x32xf32>, vector<32x32xf32>, vector<8x32xf32> -> vector<8x32xf32>
    %41 = vector.broadcast %3 : vector<8x1xf32> to vector<8x32xf32>
    %42 = arith.addf %40, %41 : vector<8x32xf32>
    %cst_32 = arith.constant 0.000000e+00 : f32
    %43 = vector.broadcast %cst_32 : f32 to vector<8x32xf32>
    %44 = arith.maximumf %42, %43 : vector<8x32xf32>
    %cst_33 = arith.constant dense<0.000000e+00> : vector<32x32xf32>
    %45 = tpu.matmul %4, %44, %cst_33 {dimension_numbers = #tpu.dot_dimension_numbers<[1], [0], [0], [1], [0, 0, 1, 1], [], []>} : vector<32x8xf32>, vector<8x32xf32>, vector<32x32xf32> -> vector<32x32xf32>
    %46 = vector.broadcast %5 : vector<32x1xf32> to vector<32x32xf32>
    %47 = arith.addf %45, %46 : vector<32x32xf32>
    %48 = arith.negf %47 : vector<32x32xf32>
    %49 = math.exp %48 : vector<32x32xf32>
    %cst_34 = arith.constant 1.000000e+00 : f32
    %50 = vector.broadcast %cst_34 : f32 to vector<32x32xf32>
    %51 = arith.addf %50, %49 : vector<32x32xf32>
    %52 = arith.divf %50, %51 : vector<32x32xf32>
    %53 = vector.extract_strided_slice %52 {offsets = [0, 0], sizes = [32, 16], strides = [1, 1]} : vector<32x32xf32> to vector<32x16xf32>
    %54 = vector.extract_strided_slice %52 {offsets = [0, 16], sizes = [32, 16], strides = [1, 1]} : vector<32x32xf32> to vector<32x16xf32>
    %c1_35 = arith.constant 1 : index
    %c0_36 = arith.constant 0 : index
    %c0_37 = arith.constant 0 : index
    %55 = vector.load %arg1[%c1_35, %c0_36, %c0_37] : memref<2x32x256xf32, #tpu.memory_space<vmem>>, vector<1x32x256xf32>
    %56 = vector.shape_cast %55 : vector<1x32x256xf32> to vector<32x256xf32>
    %c0_38 = arith.constant 0 : index
    %c0_39 = arith.constant 0 : index
    %57 = vector.load %arg3[%c0_38, %c0_39] : memref<16x256xbf16, #tpu.memory_space<vmem>>, vector<16x256xbf16>
    %58 = arith.extf %57 : vector<16x256xbf16> to vector<16x256xf32>
    %c0_40 = arith.constant 0 : index
    %c0_41 = arith.constant 0 : index
    %59 = vector.load %arg4[%c0_40, %c0_41] : memref<16x256xbf16, #tpu.memory_space<vmem>>, vector<16x256xbf16>
    %60 = arith.extf %59 : vector<16x256xbf16> to vector<16x256xf32>
    %cst_42 = arith.constant dense<0.000000e+00> : vector<32x256xf32>
    %61 = tpu.matmul %53, %58, %cst_42 {dimension_numbers = #tpu.dot_dimension_numbers<[1], [0], [0], [1], [0, 0, 1, 1], [], []>} : vector<32x16xf32>, vector<16x256xf32>, vector<32x256xf32> -> vector<32x256xf32>
    %cst_43 = arith.constant dense<0.000000e+00> : vector<32x256xf32>
    %62 = tpu.matmul %54, %60, %cst_43 {dimension_numbers = #tpu.dot_dimension_numbers<[1], [0], [0], [1], [0, 0, 1, 1], [], []>} : vector<32x16xf32>, vector<16x256xf32>, vector<32x256xf32> -> vector<32x256xf32>
    %63 = arith.mulf %56, %61 : vector<32x256xf32>
    %64 = arith.mulf %63, %62 : vector<32x256xf32>
    %c1_44 = arith.constant 1 : index
    %c0_45 = arith.constant 0 : index
    %c0_46 = arith.constant 0 : index
    %65 = vector.load %arg9[%c1_44, %c0_45, %c0_46] : memref<2x32x256xf32, #tpu.memory_space<vmem>>, vector<1x32x256xf32>
    %66 = vector.shape_cast %65 : vector<1x32x256xf32> to vector<32x256xf32>
    %67 = vector.shape_cast %64 : vector<32x256xf32> to vector<1x32x256xf32>
    tpu.vector_store %arg9[%c1_44, %c0_45, %c0_46], %67 {strides = array<i32>} : memref<2x32x256xf32, #tpu.memory_space<vmem>>, vector<1x32x256xf32>,
    return
  }
  func.func @transform_0(%arg0: i32) -> (i32, i32, i32) {
    %c0_i32 = arith.constant 0 : i32
    %c0_i32_0 = arith.constant 0 : i32
    %c0_i32_1 = arith.constant 0 : i32
    return %arg0, %c0_i32, %c0_i32_0 : i32, i32, i32
  }
  func.func @transform_1(%arg0: i32) -> (i32, i32) {
    %c0_i32 = arith.constant 0 : i32
    %c0_i32_0 = arith.constant 0 : i32
    %c0_i32_1 = arith.constant 0 : i32
    return %c0_i32, %c0_i32_0 : i32, i32
  }
  func.func @transform_2(%arg0: i32) -> (i32, i32) {
    %c0_i32 = arith.constant 0 : i32
    %c0_i32_0 = arith.constant 0 : i32
    %c0_i32_1 = arith.constant 0 : i32
    return %c0_i32, %c0_i32_0 : i32, i32
  }
  func.func @transform_3(%arg0: i32) -> (i32, i32) {
    %c0_i32 = arith.constant 0 : i32
    %c0_i32_0 = arith.constant 0 : i32
    %c0_i32_1 = arith.constant 0 : i32
    return %c0_i32, %c0_i32_0 : i32, i32
  }
  func.func @transform_4(%arg0: i32) -> (i32, i32) {
    %c0_i32 = arith.constant 0 : i32
    %c0_i32_0 = arith.constant 0 : i32
    %c0_i32_1 = arith.constant 0 : i32
    return %c0_i32, %c0_i32_0 : i32, i32
  }
  func.func @transform_5(%arg0: i32) -> (i32, i32) {
    %c0_i32 = arith.constant 0 : i32
    %c0_i32_0 = arith.constant 0 : i32
    %c0_i32_1 = arith.constant 0 : i32
    return %c0_i32, %c0_i32_0 : i32, i32
  }
  func.func @transform_6(%arg0: i32) -> (i32, i32) {
    %c0_i32 = arith.constant 0 : i32
    %c0_i32_0 = arith.constant 0 : i32
    %c0_i32_1 = arith.constant 0 : i32
    return %c0_i32, %c0_i32_0 : i32, i32
  }
  func.func @transform_7(%arg0: i32) -> (i32, i32) {
    %c0_i32 = arith.constant 0 : i32
    %c0_i32_0 = arith.constant 0 : i32
    %c0_i32_1 = arith.constant 0 : i32
    return %c0_i32, %c0_i32_0 : i32, i32
  }
  func.func @transform_8(%arg0: i32) -> (i32, i32, i32) {
    %c0_i32 = arith.constant 0 : i32
    %c0_i32_0 = arith.constant 0 : i32
    %c0_i32_1 = arith.constant 0 : i32
    return %arg0, %c0_i32, %c0_i32_0 : i32, i32, i32
  }
}

</mosaic_0001>

<bundles_post_ra>
// kernel: tpu_custom_call.1
= control target key start
LH: loop header
LB: loop body
LE: loop exit
PB: predicated region body
PF: predicated region fallthrough
CT: control target
= control target key end

     0   :  { %s2025_s0 = inlined_call_operand.vmem [shape: f32[2,32,256], index: 0, kind: input, shape index: {}]   ;;  %s2026_s1 = inlined_call_operand.vmem [shape: bf16[256,32], index: 1, kind: input, shape index: {}]   ;;  %s2027_s2 = inlined_call_operand.vmem [shape: bf16[16,256], index: 2, kind: input, shape index: {}]   ;;  %s2028_s3 = inlined_call_operand.vmem [shape: bf16[16,256], index: 3, kind: input, shape index: {}]   ;;  %s2029_s4 = inlined_call_operand.vmem [shape: f32[8,32], index: 4, kind: input, shape index: {}]   ;;  %s2030_s5 = inlined_call_operand.vmem [shape: f32[8,1], index: 5, kind: input, shape index: {}]   ;;  %s2031_s6 = inlined_call_operand.vmem [shape: f32[32,8], index: 6, kind: input, shape index: {}]   ;;  %s2032_s7 = inlined_call_operand.vmem [shape: f32[32,1], index: 7, kind: input, shape index: {}]   ;;  %s2033_s8 = inlined_call_operand.hbm [shape: f32[2,32,256], index: 8, kind: output, shape index: {}]  }
   0x1   :  { %v1308_v0 = vld [vmem:[%s2026_s1 + $0x40] sm:$0xff]   ;;  %v1309_v2 = vld [vmem:[%s2026_s1 + $0x48] sm:$0xff]   ;;  %v1310_v4 = vld [vmem:[%s2026_s1 + $0x50] sm:$0xff]  }
   0x2   :  { %v1238_v1 = vld [vmem:[%s2026_s1] sm:$0xff]   ;;  %1463 = vmatprep.subr.bf16.mxu0 %v1308_v0  ;;  %v1301_v3 = vld [vmem:[%s2026_s1 + $0x8] sm:$0xff]   ;;  %v1302_v6 = vld [vmem:[%s2026_s1 + $0x10] sm:$0xff]  }
   0x3   :  { %1465 = vmatpush3.bf16.msra.mxu0 %v1238_v1  ;;  %v1707_v5 = vld [vmem:[%s2025_s0 + $0x8] sm:$0xff]  ;;  %v1311_v7 = vld [vmem:[%s2026_s1 + $0x58] sm:$0xff]  }
   0x4   :  { %1467 = vmatprep.subr.bf16.mxu0 %v1309_v2  ;;  %176 = vmatprep.mubr.f32.mxu0 %v1707_v5 }
   0x7   :  { %1469 = vmatpush3.bf16.msra.mxu0 %v1301_v3 }
   0x8   :  { %1471 = vmatprep.subr.bf16.mxu0 %v1310_v4 }
   0x9   :  { %13 = vsyncpa [#allocation3], 0  ;;  %v1303_v8 = vld [vmem:[%s2026_s1 + $0x18] sm:$0xff]   ;;  %v1312_v9 = vld [vmem:[%s2026_s1 + $0x60] sm:$0xff]   ;;  %v1636_v24 = vmov 0.0|0.0   ;;  %vm1637_vm0 = vmmov 0  }
   0xa   :  { %v1304_v10 = vld [vmem:[%s2026_s1 + $0x20] sm:$0xff]   ;;  %v1313_v11 = vld [vmem:[%s2026_s1 + $0x68] sm:$0xff]   ;;  %v1314_v13 = vld [vmem:[%s2026_s1 + $0x70] sm:$0xff]   ;;  %1494 = vmatprep.subr.bf16.mxu1 %v1636_v24  ;;  %v1638_v25 = vmov 0.0   ;;  %v1639_v27 = vmov 0   ;;  %vm202_vm1 = vcmask 261120  }
   0xb   :  { %1473 = vmatpush3.bf16.msra.mxu0 %v1302_v6  ;;  %v1305_v12 = vld [vmem:[%s2026_s1 + $0x28] sm:$0xff]   ;;  %v1306_v14 = vld [vmem:[%s2026_s1 + $0x30] sm:$0xff]   ;;  %v1315_v15 = vld [vmem:[%s2026_s1 + $0x78] sm:$0xff]   ;;  %1432 = vmatprep.mubr.msk.f32.mxu1 %vm1637_vm0, %v1638_v25  ;;  %vm297_vm2 = vcmask 64512   ;;  %vm431_vm3 = vcmask 130048  }
   0xc   :  { %1475 = vmatprep.subr.bf16.mxu0 %v1311_v7  ;;  %v1307_v16 = vld [vmem:[%s2026_s1 + $0x38] sm:$0xff]   ;;  %v1746_v17 = vld [vmem:[%s2025_s0] sm:$0xff]  ;;  %v1758_v19 = vld [vmem:[%s2025_s0 + $0x10] sm:$0xff]  ;;  %1572 = vset.pattern.permute.xlu0 %v1639_v27 }
   0xd   :  { %v1751_v18 = vld [vmem:[%s2025_s0 + $0x18] sm:$0xff]  ;;  %v1763_v20 = vld [vmem:[%s2025_s0 + $0x28] sm:$0xff]  ;;  %v1770_v21 = vld [vmem:[%s2025_s0 + $0x20] sm:$0xff]  ;;  %1573 = vset.pattern.permute.xlu1 %v1639_v27 }
   0xe   :  { %v1775_v22 = vld [vmem:[%s2025_s0 + $0x38] sm:$0xff]  ;;  %v1782_v23 = vld [vmem:[%s2025_s0 + $0x30] sm:$0xff]  ;;  %v95_v26 = vld [vmem:[%s2030_s5] sm:$0xff] }
   0xf   :  { %1477 = vmatpush3.bf16.msra.mxu0 %v1303_v8  ;;  %199 = vperm.xlu0 %1572, %v95_v26   ;;  %v100_v28 = vld [vmem:[%s2032_s7] sm:$0xff]  ;;  %v103_v29 = vld [vmem:[%s2032_s7 + $0x18] sm:$0xff]  ;;  %v101_v46 = vld [vmem:[%s2032_s7 + $0x8] sm:$0xff] }
  0x10   :  { %1479 = vmatprep.subr.bf16.mxu0 %v1312_v9  ;;  %v1801_v44 = vld [vmem:[%s2029_s4] sm:$0xff]  ;;  %v1818_v47 = vld [vmem:[%s2025_s0 + $0x48] sm:$0xff]  ;;  %284 = vperm.xlu1 %1573, %v101_v46   ;;  %v1829_v49 = vld [vmem:[%s2025_s0 + $0x58] sm:$0xff] }
  0x11   :  { %v1808_v45 = vld [vmem:[%s2031_s6] sm:$0xff]  ;;  %v102_v50 = vld [vmem:[%s2032_s7 + $0x10] sm:$0xff]  ;;  %v1844_v52 = vld [vmem:[%s2025_s0 + $0x68] sm:$0xff] }
  0x12   :  { %v1824_v48 = vld [vmem:[%s2025_s0 + $0x40] sm:$0xff]  ;;  %v1839_v51 = vld [vmem:[%s2025_s0 + $0x50] sm:$0xff]  ;;  %v1856_v54 = vld [vmem:[%s2025_s0 + $0x78] sm:$0xff] }
  0x13   :  { %1481 = vmatpush3.bf16.msra.mxu0 %v1304_v10  ;;  %279 = vperm.xlu0 %1572, %v100_v28   ;;  %v1851_v53 = vld [vmem:[%s2025_s0 + $0x60] sm:$0xff]  ;;  %v1863_v55 = vld [vmem:[%s2025_s0 + $0x70] sm:$0xff]  ;;  %v1873_v61 = vld [vmem:[%s2031_s6 + $0x8] sm:$0xff] }
  0x14   :  { %1483 = vmatprep.subr.bf16.mxu0 %v1313_v11  ;;  %289 = vperm.xlu1 %1573, %v102_v50   ;;  %v1878_v62 = vld [vmem:[%s2031_s6 + $0x10] sm:$0xff]  ;;  %v1887_v63 = vld [vmem:[%s2031_s6 + $0x18] sm:$0xff] }
  0x17   :  { %1485 = vmatpush3.bf16.msra.mxu0 %v1305_v12  ;;  %294 = vperm.xlu0 %1572, %v103_v29  }
  0x18   :  { %1487 = vmatprep.subr.bf16.mxu0 %v1314_v13 }
  0x1b   :  { %1489 = vmatpush3.bf16.msra.mxu0 %v1306_v14 }
  0x1c   :  { %1491 = vmatprep.subr.bf16.mxu0 %v1315_v15 }
  0x1f   :  { %1493 = vmatpush3.bf16.msra.mxu0 %v1307_v16 }
  0x20   :  { %1509 = vmatprep.subr.bf16.mxu0 %v1308_v0  ;;  %v1895_v0 = vld [vmem:[%s2027_s2 + $0x4] ss:$8 sps:$4 sm:$0xff]  }
  0x22   :  { %177 = vmatmul.mubr.f32.vlgmr.msra.gmra.mrb[0].mxu0 %v1746_v17 }
  0x23   :  { %181 = vmatprep.mubr.f32.mxu0 %v1751_v18  ;;  %1511 = vmatpush3.bf16.msra.mxu0 %v1238_v1  ;;  %v1900_v1 = vld [vmem:[%s2027_s2] ss:$8 sps:$4 sm:$0xff]   ;;  %s1640_s2 = smov 112  }
  0x24   :  { %1513 = vmatprep.subr.bf16.mxu0 %v1309_v2  ;;  %v1907_v2 = vld [vmem:[%s2028_s3 + $0x4] ss:$8 sps:$4 sm:$0xff]  }
  0x26   :  { %182 = vmatmul.mubr.f32.gmra.mrb[2].mxu0 %v1758_v19 }
  0x27   :  { %186 = vmatprep.mubr.f32.mxu0 %v1763_v20  ;;  %1515 = vmatpush3.bf16.msra.mxu0 %v1301_v3 }
  0x28   :  { %1517 = vmatprep.subr.bf16.mxu0 %v1310_v4  ;;  %v1912_v4 = vld [vmem:[%s2028_s3] ss:$8 sps:$4 sm:$0xff]   ;;  %s1641_s3 = smov [#allocation2]  }
  0x29   :  { %s1184_s22 = sshll.u32 %s1641_s3, 4  ;;  %s1185_s22 = int_to_ptr.vmem [resolvable:$true] %s1184_s22 }
  0x2a   :  { %187 = vmatmul.mubr.f32.gmra.mrb[4].mxu0 %v1770_v21  ;;  %s1612_s1 = scalar_lea.vmem %s1185_s22, 2048  ;;  %p1617_p1 = scmp.lt.s32.totalorder %s1185_s22, %s1185_s22 }
  0x2b   :  { %191 = vmatprep.mubr.f32.mxu0 %v1775_v22  ;;  %1519 = vmatpush3.bf16.msra.mxu0 %v1302_v6  ;;  %p1613_p0 = scmp.ne.s32.totalorder %s1185_s22, %s1612_s1  ;;  %p1618_p2 = scmp.lt.s32.totalorder %s1612_s1, %s1612_s1 }
  0x2c   :  { %1521 = vmatprep.subr.bf16.mxu0 %v1311_v7 }
  0x2d   :  { %p1619_p3 = por %p1618_p2, %p1617_p1 }
  0x2e   :  { %192 = vmatmul.mubr.f32.gmra.mrb[6].mxu0 %v1782_v23 }
  0x2f   :  { %1523 = vmatpush3.bf16.msra.mxu0 %v1303_v8  ;;  %735 = vmatprep.mubr.f32.mxu0 %v1818_v47  ;;  %p1620_p4 = pnand %p1619_p3, %p1613_p0 }
  0x30   :  { %1525 = vmatprep.subr.bf16.mxu0 %v1312_v9 }
  0x33   :  { %1527 = vmatpush3.bf16.msra.mxu0 %v1304_v10 }
  0x34   :  { %1529 = vmatprep.subr.bf16.mxu0 %v1313_v11 }
  0x37   :  { %1531 = vmatpush3.bf16.msra.mxu0 %v1305_v12 }
  0x38   :  { %1533 = vmatprep.subr.bf16.mxu0 %v1314_v13 }
  0x3b   :  { %1535 = vmatpush3.bf16.msra.mxu0 %v1306_v14 }
  0x3c   :  { %1537 = vmatprep.subr.bf16.mxu0 %v1315_v15 }
  0x3f   :  { %1539 = vmatpush3.bf16.msra.mxu0 %v1307_v16 }
  0x40   :  { %1551 = vmatprep.subr.bf16.mxu0 %v1907_v2 }
  0x42   :  { %736 = vmatmul.mubr.f32.vlgmr.msra.gmra.mrb[8].mxu0 %v1824_v48 }
  0x43   :  { %740 = vmatprep.mubr.f32.mxu0 %v1829_v49  ;;  %1553 = vmatpush1.bf16.msra.mxu0 %v1912_v4 }
  0x46   :  { %741 = vmatmul.mubr.f32.gmra.mrb[10].mxu0 %v1839_v51 }
  0x47   :  { %745 = vmatprep.mubr.f32.mxu0 %v1844_v52 }
  0x4a   :  { %746 = vmatmul.mubr.f32.gmra.mrb[12].mxu0 %v1851_v53 }
  0x4b   :  { %750 = vmatprep.mubr.f32.mxu0 %v1856_v54 }
  0x4e   :  { %751 = vmatmul.mubr.f32.gmra.mrb[14].mxu0 %v1863_v55 }
  0x4f   :  { %1129 = vmatprep.mubr.f32.mxu0 %v1638_v25 }
  0x8e   :  { %v1867_v56 = vpop.permute.xlu0 %199 }
  0x8f   :  { %v1923_v13 = vpop.permute.xlu1 %284 }
  0x92   :  { %v1925_v14 = vpop.permute.xlu0 %279 }
  0x93   :  { %v1929_v29 = vpop.permute.xlu1 %289 }
  0xf5   :  { %v1348_v30 = vpop.f32.mrb[0].mxu0 }
  0xf6   :  { %v1349_v31 = vpop.f32.mrb[1].mxu0 }
  0xf7   :  { %v1350_v32 = vadd.f32 %v1349_v31, %v1348_v30  ;;  %v1931_v30 = vpop.permute.xlu0 %294 }
  0xf9   :  { %v1351_v33 = vpop.f32.mrb[2].mxu0 }
  0xfa   :  { %v1352_v34 = vpop.f32.mrb[3].mxu0 }
  0xfb   :  { %v1353_v35 = vadd.f32 %v1352_v34, %v1351_v33 }
  0xfd   :  { %v1354_v36 = vpop.f32.mrb[4].mxu0  ;;  %v1495_v37 = vpack.c.bf16 %v1353_v35, %v1350_v32 }
  0xfe   :  { %v1355_v38 = vpop.f32.mrb[5].mxu0 }
  0xff   :  { %v1356_v39 = vadd.f32 %v1355_v38, %v1354_v36  ;;  %1496 = vmatpush3.bf16.msra.mxu1 %v1495_v37 }
 0x100   :  { %1497 = vmatprep.subr.bf16.mxu1 %v1636_v24 }
 0x101   :  { %v1357_v40 = vpop.f32.mrb[6].mxu0 }
 0x102   :  { %v1358_v41 = vpop.f32.mrb[7].mxu0 }
 0x103   :  { %v1359_v42 = vadd.f32 %v1358_v41, %v1357_v40 }
 0x105   :  { %v1498_v43 = vpack.c.bf16 %v1359_v42, %v1356_v39 }
 0x107   :  { %1499 = vmatpush3.bf16.msra.mxu1 %v1498_v43 }
 0x10a   :  { %1433 = vmatmul.mubr.msk.f32.vlgmr.msra.gmra.mrb[0].mxu1 %vm202_vm1, %v1801_v44 }
 0x10b   :  { %1437 = vmatprep.mubr.msk.f32.mxu1 %vm297_vm2, %v1808_v45 }
 0x115   :  { %v1402_v3 = vpop.f32.mrb[8].mxu0 }
 0x116   :  { %v1403_v6 = vpop.f32.mrb[9].mxu0 }
 0x117   :  { %v1915_v7 = vadd.f32 %v1403_v6, %v1402_v3 }
 0x119   :  { %v1405_v8 = vpop.f32.mrb[10].mxu0 }
 0x11a   :  { %v1406_v9 = vpop.f32.mrb[11].mxu0 }
 0x11b   :  { %v1919_v10 = vadd.f32 %v1406_v9, %v1405_v8 }
 0x11d   :  { %v1408_v11 = vpop.f32.mrb[12].mxu0  ;;  %v1541_v12 = vpack.c.bf16 %v1919_v10, %v1915_v7 }
 0x11e   :  { %v1409_v39 = vpop.f32.mrb[13].mxu0 }
 0x11f   :  { %v1410_v42 = vadd.f32 %v1409_v39, %v1408_v11 }
 0x121   :  { %v1411_v46 = vpop.f32.mrb[14].mxu0 }
 0x122   :  { %v1412_v50 = vpop.f32.mrb[15].mxu0 }
 0x1dd   :  { %v272_v57 = vpop.f32.mrb[0].mxu1 }
 0x1de   :  { %v273_v58 = vadd.f32 %v272_v57, %v1867_v56  ;;  %v1434_v59 = vpop.f32.mrb[1].mxu1 }
 0x1e0   :  { %v276_v60 = vmax.f32 %v273_v58, 0.0  ;;  %v1413_v58 = vadd.f32 %v1412_v50, %v1411_v46 }
 0x1e2   :  { %1435 = vmatprep.subr.mxu1 %v276_v60  ;;  %v1544_v6 = vpack.c.bf16 %v1413_v58, %v1410_v42 }
 0x1e3   :  { %1436 = vmatpush3.msra.mxu1 %v276_v60 }
 0x1e4   :  { %1438 = vmatmul.mubr.msk.f32.vlgmr.msra.gmra.mrb[2].mxu1 %vm297_vm2, %v1873_v61  ;;  %1501 = vmatprep.subr.bf16.mxu1 %v1895_v0 }
 0x1e5   :  { %1440 = vmatprep.mubr.msk.f32.mxu1 %vm297_vm2, %v1878_v62  ;;  %1503 = vmatpush1.bf16.msra.mxu1 %v1900_v1 }
 0x1e6   :  { %1505 = vmatprep.subr.bf16.mxu1 %v1907_v2 }
 0x1e8   :  { %1441 = vmatmul.mubr.msk.f32.gmra.mrb[4].mxu1 %vm297_vm2, %v1887_v63 }
 0x1e9   :  { %508 = vmatprep.mubr.f32.mxu1 %v1638_v25 }
 0x2b7   :  { %v1439_v15 = vpop.f32.mrb[2].mxu1 }
 0x2b8   :  { %v382_v16 = vadd.f32 %v1439_v15, %v1923_v13  ;;  %v376_v26 = vpop.f32.mrb[3].mxu1 }
 0x2b9   :  { %v377_v27 = vadd.f32 %v376_v26, %v1925_v14 }
 0x2ba   :  { %v1201_v28 = vmul.f32 -1.442695, %v382_v16 }
 0x2bb   :  { %v1200_v31 = vmul.f32 -1.442695, %v377_v27  ;;  %v1442_v32 = vpop.f32.mrb[4].mxu1 }
 0x2bc   :  { %1580 = vpow2.f32 %v1201_v28  ;;  %v392_v33 = vadd.f32 %v1442_v32, %v1931_v30  ;;  %v386_v34 = vpop.f32.mrb[5].mxu1 }
 0x2bd   :  { %1582 = vpow2.f32 %v1200_v31  ;;  %v387_v35 = vadd.f32 %v386_v34, %v1929_v29 }
 0x2be   :  { %v1203_v36 = vmul.f32 -1.442695, %v392_v33 }
 0x2bf   :  { %v1202_v37 = vmul.f32 -1.442695, %v387_v35 }
 0x2c0   :  { %1584 = vpow2.f32 %v1203_v36 }
 0x2c1   :  { %1586 = vpow2.f32 %v1202_v37 }
 0x2c6   :  { %v1581_v38 = vpop.eup %1580 }
 0x2c7   :  { %v1583_v40 = vpop.eup %1582  ;;  %v408_v41 = vadd.f32 1.0, %v1581_v38 }
 0x2c8   :  { %v407_v43 = vadd.f32 1.0, %v1583_v40 }
 0x2c9   :  { %1588 = vrcp.f32 %v408_v41 }
 0x2ca   :  { %v1585_v57 = vpop.eup %1584  ;;  %1590 = vrcp.f32 %v407_v43 }
 0x2cb   :  { %v1587_v59 = vpop.eup %1586  ;;  %v410_v60 = vadd.f32 1.0, %v1585_v57 }
 0x2cc   :  { %v409_v3 = vadd.f32 1.0, %v1587_v59 }
 0x2cd   :  { %1592 = vrcp.f32 %v410_v60 }
 0x2ce   :  { %1594 = vrcp.f32 %v409_v3 }
 0x2d3   :  { %v1589_v7 = vpop.eup %1588 }
 0x2d4   :  { %v1591_v8 = vpop.eup %1590  ;;  %535 = vrot.lane.b32.xlu0 %v1589_v7, %s1640_s2 }
 0x2d5   :  { %533 = vrot.lane.b32.xlu1 %v1591_v8, %s1640_s2  ;;  %1204 = vmatmul.mubr.msk.f32.vlgmr.msra.gmra.mrb[6].mxu1 %vm431_vm3, %v1591_v8 }
 0x2d6   :  { %514 = vmatprep.mubr.f32.mxu1 %v1638_v25  ;;  %1507 = vmatpush1.bf16.msra.mxu1 %v1912_v4 }
 0x2d7   :  { %v1593_v9 = vpop.eup %1592  ;;  %1540 = vmatprep.subr.bf16.mxu1 %v1636_v24 }
 0x2d8   :  { %v1595_v10 = vpop.eup %1594  ;;  %539 = vrot.lane.b32.xlu0 %v1593_v9, %s1640_s2 }
 0x2d9   :  { %537 = vrot.lane.b32.xlu1 %v1595_v10, %s1640_s2  ;;  %1205 = vmatmul.mubr.msk.f32.gmra.mrb[8].mxu1 %vm431_vm3, %v1589_v7 }
 0x2da   :  { %520 = vmatprep.mubr.f32.mxu1 %v1638_v25 }
 0x2dd   :  { %1206 = vmatmul.mubr.msk.f32.gmra.mrb[10].mxu1 %vm431_vm3, %v1595_v10 }
 0x2de   :  { %526 = vmatprep.mubr.f32.mxu1 %v1638_v25 }
 0x2e1   :  { %1207 = vmatmul.mubr.msk.f32.gmra.mrb[12].mxu1 %vm431_vm3, %v1593_v9 }
 0x2e2   :  { %613 = vmatprep.mubr.f32.mxu1 %v1638_v25 }
 0x346   :  { %v536_v15 = vpop.permute.xlu0 %535 }
 0x347   :  { %v534_v11 = vpop.permute.xlu1 %533 }
 0x348   :  { %1208 = vmatmul.mubr.msk.f32.vlgmr.msra.gmra.mrb[14].mxu1 %vm431_vm3, %v534_v11 }
 0x349   :  { %1542 = vmatpush3.bf16.msra.mxu1 %v1541_v12  ;;  %619 = vmatprep.mubr.f32.mxu1 %v1638_v25 }
 0x34a   :  { %1543 = vmatprep.subr.bf16.mxu1 %v1636_v24  ;;  %v540_v26 = vpop.permute.xlu0 %539 }
 0x34b   :  { %v538_v16 = vpop.permute.xlu1 %537 }
 0x34c   :  { %1209 = vmatmul.mubr.msk.f32.gmra.mrb[16].mxu1 %vm431_vm3, %v536_v15 }
 0x34d   :  { %1545 = vmatpush3.bf16.msra.mxu1 %v1544_v6  ;;  %625 = vmatprep.mubr.f32.mxu1 %v1638_v25 }
 0x350   :  { %1210 = vmatmul.mubr.msk.f32.gmra.mrb[18].mxu1 %vm431_vm3, %v538_v16 }
 0x351   :  { %631 = vmatprep.mubr.f32.mxu1 %v1638_v25 }
 0x354   :  { %1211 = vmatmul.mubr.msk.f32.gmra.mrb[20].mxu1 %vm431_vm3, %v540_v26 }
 0x355   :  { %1451 = vmatprep.mubr.msk.f32.mxu1 %vm1637_vm0, %v1638_v25 }
 0x358   :  { %1452 = vmatmul.mubr.msk.f32.vlgmr.msra.gmra.mrb[22].mxu1 %vm202_vm1, %v1801_v44 }
 0x359   :  { %1456 = vmatprep.mubr.msk.f32.mxu1 %vm297_vm2, %v1808_v45 }
 0x3a8   :  { %v510_v24 = vpop.f32.mrb[6].mxu1 }
 0x3a9   :  { %v512_v12 = vpop.f32.mrb[7].mxu1  ;;  %v638_v35 = vmul.f32 %v510_v24, %v1746_v17 }
 0x3aa   :  { %v639_v36 = vmul.f32 %v512_v12, %v1707_v5 }
 0x3ac   :  { %v516_v27 = vpop.f32.mrb[8].mxu1 }
 0x3ad   :  { %v518_v28 = vpop.f32.mrb[9].mxu1  ;;  %v640_v44 = vmul.f32 %v516_v27, %v1758_v19 }
 0x3ae   :  { %v641_v45 = vmul.f32 %v518_v28, %v1751_v18 }
 0x3b0   :  { %v522_v31 = vpop.f32.mrb[10].mxu1 }
 0x3b1   :  { %v524_v32 = vpop.f32.mrb[11].mxu1  ;;  %v642_v50 = vmul.f32 %v522_v31, %v1770_v21 }
 0x3b2   :  { %v643_v17 = vmul.f32 %v524_v32, %v1763_v20 }
 0x3b4   :  { %v528_v33 = vpop.f32.mrb[12].mxu1 }
 0x3b5   :  { %v530_v34 = vpop.f32.mrb[13].mxu1  ;;  %v644_v19 = vmul.f32 %v528_v33, %v1782_v23 }
 0x3b6   :  { %v645_v18 = vmul.f32 %v530_v34, %v1775_v22 }
 0x41b   :  { %v615_v37 = vpop.f32.mrb[14].mxu1 }
 0x41c   :  { %v646_v38 = vmul.f32 %v638_v35, %v615_v37  ;;  %v617_v39 = vpop.f32.mrb[15].mxu1 }
 0x41d   :  { %v647_v40 = vmul.f32 %v639_v36, %v617_v39 }
 0x41e   :  { %654 = vst [vmem:[#allocation2] sm:$0xff] %v646_v38 }
 0x41f   :  { %655 = vst [vmem:[#allocation2 + $0x8] sm:$0xff] %v647_v40  ;;  %v621_v41 = vpop.f32.mrb[16].mxu1 }
 0x420   :  { %v648_v42 = vmul.f32 %v640_v44, %v621_v41  ;;  %v623_v43 = vpop.f32.mrb[17].mxu1 }
 0x421   :  { %v649_v46 = vmul.f32 %v641_v45, %v623_v43 }
 0x422   :  { %656 = vst [vmem:[#allocation2 + $0x10] sm:$0xff] %v648_v42 }
 0x423   :  { %657 = vst [vmem:[#allocation2 + $0x18] sm:$0xff] %v649_v46  ;;  %v627_v5 = vpop.f32.mrb[18].mxu1 }
 0x424   :  { %v650_v57 = vmul.f32 %v642_v50, %v627_v5  ;;  %v629_v58 = vpop.f32.mrb[19].mxu1 }
 0x425   :  { %v651_v59 = vmul.f32 %v643_v17, %v629_v58 }
 0x426   :  { %658 = vst [vmem:[#allocation2 + $0x20] sm:$0xff] %v650_v57 }
 0x427   :  { %659 = vst [vmem:[#allocation2 + $0x28] sm:$0xff] %v651_v59  ;;  %v633_v60 = vpop.f32.mrb[20].mxu1 }
 0x428   :  { %v652_v3 = vmul.f32 %v644_v19, %v633_v60  ;;  %v635_v6 = vpop.f32.mrb[21].mxu1 }
 0x429   :  { %v653_v7 = vmul.f32 %v645_v18, %v635_v6 }
 0x42a   :  { %660 = vst [vmem:[#allocation2 + $0x30] sm:$0xff] %v652_v3 }
 0x42b   :  { %661 = vst [vmem:[#allocation2 + $0x38] sm:$0xff] %v653_v7  ;;  %v822_v21 = vpop.f32.mrb[22].mxu1 }
 0x42c   :  { %v823_v20 = vadd.f32 %v822_v21, %v1867_v56  ;;  %v1453_v8 = vpop.f32.mrb[23].mxu1 }
 0x42e   :  { %v826_v9 = vmax.f32 %v823_v20, 0.0 }
 0x430   :  { %1454 = vmatprep.subr.mxu1 %v826_v9 }
 0x431   :  { %1455 = vmatpush3.msra.mxu1 %v826_v9 }
 0x432   :  { %1457 = vmatmul.mubr.msk.f32.vlgmr.msra.gmra.mrb[24].mxu1 %vm297_vm2, %v1873_v61  ;;  %1547 = vmatprep.subr.bf16.mxu1 %v1895_v0 }
 0x433   :  { %1459 = vmatprep.mubr.msk.f32.mxu1 %vm297_vm2, %v1878_v62  ;;  %1549 = vmatpush1.bf16.msra.mxu1 %v1900_v1 }
 0x434   :  { %1554 = vmatprep.subr.bf16.mxu1 %v1907_v2 }
 0x436   :  { %1460 = vmatmul.mubr.msk.f32.gmra.mrb[26].mxu1 %vm297_vm2, %v1887_v63 }
 0x437   :  { %1024 = vmatprep.mubr.f32.mxu1 %v1638_v25 }
 0x505   :  { %v1458_v22 = vpop.f32.mrb[24].mxu1 }
 0x506   :  { %v899_v23 = vadd.f32 %v1458_v22, %v1923_v13  ;;  %v893_v56 = vpop.f32.mrb[25].mxu1 }
 0x507   :  { %v894_v61 = vadd.f32 %v893_v56, %v1925_v14 }
 0x508   :  { %v1226_v10 = vmul.f32 -1.442695, %v899_v23 }
 0x509   :  { %v1225_v0 = vmul.f32 -1.442695, %v894_v61  ;;  %v1461_v11 = vpop.f32.mrb[26].mxu1 }
 0x50a   :  { %1596 = vpow2.f32 %v1226_v10  ;;  %v909_v62 = vadd.f32 %v1461_v11, %v1931_v30  ;;  %v903_v1 = vpop.f32.mrb[27].mxu1 }
 0x50b   :  { %1598 = vpow2.f32 %v1225_v0  ;;  %v904_v2 = vadd.f32 %v903_v1, %v1929_v29 }
 0x50c   :  { %v1228_v15 = vmul.f32 -1.442695, %v909_v62 }
 0x50d   :  { %v1227_v63 = vmul.f32 -1.442695, %v904_v2 }
 0x50e   :  { %1600 = vpow2.f32 %v1228_v15 }
 0x50f   :  { %1602 = vpow2.f32 %v1227_v63 }
 0x514   :  { %v1597_v16 = vpop.eup %1596 }
 0x515   :  { %v1599_v26 = vpop.eup %1598  ;;  %v925_v24 = vadd.f32 1.0, %v1597_v16 }
 0x516   :  { %v924_v13 = vadd.f32 1.0, %v1599_v26 }
 0x518   :  { %v1601_v12 = vpop.eup %1600  ;;  %1604 = vrcp.f32 %v924_v13 }
 0x519   :  { %v1603_v14 = vpop.eup %1602  ;;  %1606 = vrcp.f32 %v925_v24  ;;  %v927_v28 = vadd.f32 1.0, %v1601_v12 }
 0x51a   :  { %v926_v27 = vadd.f32 1.0, %v1603_v14 }
 0x51c   :  { %1608 = vrcp.f32 %v926_v27 }
 0x51d   :  { %1610 = vrcp.f32 %v927_v28 }
 0x522   :  { %v1605_v30 = vpop.eup %1604 }
 0x523   :  { %1049 = vrot.lane.b32.xlu1 %v1605_v30, %s1640_s2  ;;  %1229 = vmatmul.mubr.msk.f32.vlgmr.msra.gmra.mrb[28].mxu1 %vm431_vm3, %v1605_v30  ;;  %v1607_v29 = vpop.eup %1606 }
 0x524   :  { %1030 = vmatprep.mubr.f32.mxu1 %v1638_v25  ;;  %1555 = vmatpush1.bf16.msra.mxu1 %v1912_v4 }
 0x526   :  { %v1609_v31 = vpop.eup %1608 }
 0x527   :  { %1053 = vrot.lane.b32.xlu0 %v1609_v31, %s1640_s2  ;;  %1051 = vrot.lane.b32.xlu1 %v1607_v29, %s1640_s2  ;;  %v1611_v32 = vpop.eup %1610 }
 0x528   :  { %1230 = vmatmul.mubr.msk.f32.gmra.mrb[30].mxu1 %vm431_vm3, %v1607_v29 }
 0x529   :  { %1036 = vmatprep.mubr.f32.mxu1 %v1638_v25 }
 0x52b   :  { %1055 = vrot.lane.b32.xlu0 %v1611_v32, %s1640_s2 }
 0x52c   :  { %1231 = vmatmul.mubr.msk.f32.gmra.mrb[32].mxu1 %vm431_vm3, %v1609_v31 }
 0x52d   :  { %1042 = vmatprep.mubr.f32.mxu1 %v1638_v25 }
 0x530   :  { %1232 = vmatmul.mubr.msk.f32.gmra.mrb[34].mxu1 %vm431_vm3, %v1611_v32 }
 0x531   :  { %1141 = vmatprep.mubr.f32.mxu1 %v1638_v25 }
 0x595   :  { %v1050_v4 = vpop.permute.xlu1 %1049 }
 0x596   :  { %1233 = vmatmul.mubr.msk.f32.vlgmr.msra.gmra.mrb[16].mxu0 %vm431_vm3, %v1050_v4 }
 0x597   :  { %1135 = vmatprep.mubr.f32.mxu0 %v1638_v25 }
 0x599   :  { %v1054_v33 = vpop.permute.xlu0 %1053  ;;  %v1052_v34 = vpop.permute.xlu1 %1051 }
 0x59a   :  { %1234 = vmatmul.mubr.msk.f32.gmra.mrb[18].mxu0 %vm431_vm3, %v1052_v34  ;;  %1235 = vmatmul.mubr.msk.f32.vlgmr.msra.gmra.mrb[36].mxu1 %vm431_vm3, %v1054_v33 }
 0x59b   :  { %1147 = vmatprep.mubr.f32.mxu1 %v1638_v25 }
 0x59d   :  { %v1056_v35 = vpop.permute.xlu0 %1055 }
 0x59e   :  { %1236 = vmatmul.mubr.msk.f32.gmra.mrb[38].mxu1 %vm431_vm3, %v1056_v35 }
 0x5f6   :  { %v1026_v36 = vpop.f32.mrb[28].mxu1 }
 0x5f7   :  { %v1028_v37 = vpop.f32.mrb[29].mxu1  ;;  %v1154_v42 = vmul.f32 %v1824_v48, %v1026_v36 }
 0x5f8   :  { %v1155_v43 = vmul.f32 %v1818_v47, %v1028_v37 }
 0x5fb   :  { %v1032_v38 = vpop.f32.mrb[30].mxu1 }
 0x5fc   :  { %v1034_v39 = vpop.f32.mrb[31].mxu1  ;;  %v1156_v25 = vmul.f32 %v1839_v51, %v1032_v38 }
 0x5fd   :  { %v1157_v58 = vmul.f32 %v1829_v49, %v1034_v39 }
 0x5ff   :  { %v1038_v40 = vpop.f32.mrb[32].mxu1 }
 0x600   :  { %v1040_v44 = vpop.f32.mrb[33].mxu1  ;;  %v1158_v57 = vmul.f32 %v1851_v53, %v1038_v40 }
 0x601   :  { %v1159_v59 = vmul.f32 %v1844_v52, %v1040_v44 }
 0x603   :  { %v1044_v45 = vpop.f32.mrb[34].mxu1 }
 0x604   :  { %v1046_v41 = vpop.f32.mrb[35].mxu1  ;;  %v1160_v21 = vmul.f32 %v1863_v55, %v1044_v45 }
 0x605   :  { %v1161_v51 = vmul.f32 %v1856_v54, %v1046_v41 }
 0x669   :  { %v1131_v46 = vpop.f32.mrb[16].mxu0 }
 0x66a   :  { %v1162_v50 = vmul.f32 %v1154_v42, %v1131_v46  ;;  %v1133_v17 = vpop.f32.mrb[17].mxu0 }
 0x66b   :  { %v1163_v5 = vmul.f32 %v1155_v43, %v1133_v17 }
 0x66c   :  { %1171 = vst [vmem:[#allocation2 + $0x40] sm:$0xff] %v1162_v50 }
 0x66d   :  { %1172 = vst [vmem:[#allocation2 + $0x48] sm:$0xff] %v1163_v5  ;;  %v1137_v19 = vpop.f32.mrb[18].mxu0  ;;  %v1143_v18 = vpop.f32.mrb[36].mxu1 }
 0x66e   :  { %v1164_v60 = vmul.f32 %v1156_v25, %v1137_v19  ;;  %v1166_v48 = vmul.f32 %v1158_v57, %v1143_v18  ;;  %v1139_v3 = vpop.f32.mrb[19].mxu0  ;;  %v1145_v47 = vpop.f32.mrb[37].mxu1 }
 0x66f   :  { %v1165_v6 = vmul.f32 %v1157_v58, %v1139_v3  ;;  %v1167_v7 = vmul.f32 %v1159_v59, %v1145_v47 }
 0x670   :  { %1173 = vst [vmem:[#allocation2 + $0x50] sm:$0xff] %v1164_v60  ;;  %1175 = vst [vmem:[#allocation2 + $0x60] sm:$0xff] %v1166_v48 }
 0x671   :  { %1174 = vst [vmem:[#allocation2 + $0x58] sm:$0xff] %v1165_v6  ;;  %1176 = vst [vmem:[#allocation2 + $0x68] sm:$0xff] %v1167_v7  ;;  %v1149_v49 = vpop.f32.mrb[38].mxu1 }
 0x672   :  { %v1168_v52 = vmul.f32 %v1160_v21, %v1149_v49  ;;  %v1151_v53 = vpop.f32.mrb[39].mxu1 }
 0x673   :  { %v1169_v20 = vmul.f32 %v1161_v51, %v1151_v53 }
 0x674   :  { %1177 = vst [vmem:[#allocation2 + $0x70] sm:$0xff] %v1168_v52 }
 0x675   :  { %1178 = vst [vmem:[#allocation2 + $0x78] sm:$0xff] %v1169_v20 }
 0x676   :  { %1623 = shalt.err (!%p1620_p4)
}
 0x677   :  { %s1624_s25 = scalar_lea.hbm %s2033_s8, 2048 }
 0x678   :  { %p1625_p5 = scmp.ne.s32.totalorder %s2033_s8, %s1624_s25  ;;  %p1628_p6 = scmp.lt.u32.totalorder %s1624_s25, %s2033_s8 }
 0x67a   :  { %p1630_p7 = pnand %p1628_p6, %p1625_p5 }
 0x67c   :  { %1633 = shalt.err (!%p1630_p7)
}
 0x67d   :  { %s1642_s29 = smov 256   ;;  %s1643_s30 = smov 16  }
 0x67e   :  { %1190 = dma.vmem_to_hbm [thread:$0]  %s1185_s22, 2048, %s2033_s8, [#allocation3], %s1642_s29, %s1642_s29, %s1643_s30  }
 0x67f   :  { %1634 = dma.done.wait [#allocation3], 2048  }
 0x680   :  { %1635 = vsyncadd [#allocation3], 4294965248 }
 0x681   :  { %1194 = vsyncpa [#allocation3], 1 }

</bundles_post_ra>
